<compile_context>
chip_gen: v5e
topology: v5e:2x2
jax: 0.10.0
libtpu: 0.0.40
codegen_flags: <defaults>
</compile_context>

<pallas_src>
from functools import lru_cache, partial
from typing import Optional, Tuple, Union

import jax
import jax.numpy as jnp
from jax import lax
from jax.experimental import pallas as pl
from jax.experimental.pallas import tpu as pltpu

_LANE = 128


def _pair(v) -> Tuple[int, int]:
    return (v, v) if isinstance(v, int) else tuple(v)


def _ceil_div(a: int, b: int) -> int:
    return -(-a // b)


@lru_cache(maxsize=1)
def _vmem_params() -> Tuple[int, int]:
    """(per-step footprint budget, vmem_limit_bytes), generation-aware.

    v5e/v6e have 128 MiB VMEM -> larger tiles / fewer ~0.35us grid steps.
    v7x has only 64 MiB -> conservative.  Unknown hardware -> conservative."""
    cap = 0
    try:
        cap = int(getattr(pltpu.get_tpu_info(), "vmem_capacity_bytes", 0) or 0)
    except Exception:
        cap = 0
    if cap >= 96 * 1024 * 1024:                 # v5e / v6e (128 MiB VMEM)
        return 24 * 1024 * 1024, 96 * 1024 * 1024
    return 9 * 1024 * 1024, 44 * 1024 * 1024    # v7x (64 MiB) / unknown


# -----------------------------------------------------------------------------
# MaxPool2d kernel (channels-last, lane-dense (H, W, N*C) layout)
# -----------------------------------------------------------------------------


def _pool_plane(xp, *, kh, kw, sh, sw, dh, dw, Ho, Wo):
    """Separable window max of an (Hb, Wb, C) value -> (Ho, Wo, C).

    kw shifted maxima over contiguous W slices, one strided W subsample, then
    kh shifted maxima over H and one strided H subsample.  Keeps (W, C) as the
    (sublane, lane) pair; the strided subsamples run on the XLU slot."""
    Hb, Wb, _ = xp.shape

    Wc = Wb - dw * (kw - 1)
    cmax = xp[:, :Wc, :]
    for j in range(1, kw):                       # static python loop (kw is compile-time)
        cmax = jnp.maximum(cmax, xp[:, j * dw: j * dw + Wc, :])
    if sw > 1:
        cmax = cmax[:, : (Wo - 1) * sw + 1: sw, :]
    else:
        cmax = cmax[:, :Wo, :]

    Hc = Hb - dh * (kh - 1)
    rmax = cmax[:Hc]
    for i in range(1, kh):
        rmax = jnp.maximum(rmax, cmax[i * dh: i * dh + Hc])
    if sh > 1:
        rmax = rmax[: (Ho - 1) * sh + 1: sh]
    else:
        rmax = rmax[:Ho]
    return rmax


def _maxpool_kernel(x_ref, o_ref, *scratch,
                    kh, kw, sh, sw, dh, dw, ph, pw, Ho, Wo, fuse_relu):
    """x_ref: (Hb, W, TNC) block; o_ref: (Ho, Wo, TNC) block."""
    Hb, Wb, Cb = x_ref.shape
    x = x_ref[...]
    if fuse_relu:
        x = jnp.maximum(x, 0)        # fused ReLU: free VPU filler under the DMA
    if ph or pw:
        pad_ref = scratch[0]
        Hp, Wp, _ = pad_ref.shape
        dt = pad_ref.dtype
        # Border-only -inf fill (top/bottom row strips, then left/right strips).
        if ph:
            pad_ref[0:ph, :, :] = jnp.full((ph, Wp, Cb), -jnp.inf, dt)
            pad_ref[ph + Hb:Hp, :, :] = jnp.full((Hp - ph - Hb, Wp, Cb), -jnp.inf, dt)
        if pw:
            pad_ref[ph:ph + Hb, 0:pw, :] = jnp.full((Hb, pw, Cb), -jnp.inf, dt)
            pad_ref[ph:ph + Hb, pw + Wb:Wp, :] = jnp.full((Hb, Wp - pw - Wb, Cb), -jnp.inf, dt)
        pad_ref[ph:ph + Hb, pw:pw + Wb, :] = x
        xp = pad_ref[...]
    else:
        xp = x
    out = _pool_plane(xp, kh=kh, kw=kw, sh=sh, sw=sw, dh=dh, dw=dw, Ho=Ho, Wo=Wo)
    o_ref[...] = out.astype(o_ref.dtype)


@partial(jax.jit,
         static_argnames=("kernel_size", "stride", "padding", "dilation", "fuse_relu"))
def max_pool2d_cl(xcl, *, kernel_size, stride, padding, dilation, fuse_relu=False):
    """Max-pool a channels-last (H, W, N*C) array -> (Ho, Wo, N*C)."""
    if not jnp.issubdtype(xcl.dtype, jnp.floating):
        raise TypeError("max_pool2d_cl supports floating-point inputs only")
    H, W, NC = xcl.shape
    kh, kw = kernel_size
    sh, sw = stride
    ph, pw = padding
    dh, dw = dilation

    # Same output-size formula as torch.nn.functional.max_pool2d (floor mode).
    Hp, Wp = H + 2 * ph, W + 2 * pw
    Ho = (Hp - dh * (kh - 1) - 1) // sh + 1
    Wo = (Wp - dw * (kw - 1) - 1) // sw + 1

    itemsize = jnp.dtype(xcl.dtype).itemsize
    budget, vmem_limit = _vmem_params()
    padded = (ph > 0) or (pw > 0)
    # Disjoint H-tiling is only expressible with BlockSpec when windows do not
    # overlap rows and there is no padding to re-create per tile.
    # TODO(synk): halo-based H-tiling (manual DMA) for overlapping/padded pools.
    clean_h = (not padded) and (dh * (kh - 1) + 1 <= sh)

    if clean_h:
        # Bytes per output row per lane: dbl-buffered in/out + cmax/rmax temps.
        per_row = itemsize * (2 * sh * W + 3 * Wo + sh * Wo)
        if NC <= _LANE:
            TNC, NC_pad = NC, NC
            # TODO(synk): small N*C under-fills the 128 lanes; folding W into
            # lanes would lift utilisation for early-layer small shapes.
        else:
            groups = _ceil_div(NC, _LANE)
            t = max(1, min(groups, budget // max(per_row * Ho * _LANE, 1)))
            TNC = t * _LANE
            NC_pad = _ceil_div(groups, t) * TNC
        THo = max(1, min(Ho, budget // max(per_row * TNC, 1)))
        grid_q = _ceil_div(Ho, THo)
        Ho_pad = grid_q * THo

        x_in = xcl
        if NC_pad != NC:
            x_in = jnp.pad(x_in, ((0, 0), (0, 0), (0, NC_pad - NC)))
        need_rows = Ho_pad * sh
        if need_rows > H:
            x_in = jnp.pad(x_in, ((0, need_rows - H), (0, 0), (0, 0)))

        kernel = partial(_maxpool_kernel, kh=kh, kw=kw, sh=sh, sw=sw, dh=dh,
                         dw=dw, ph=0, pw=0, Ho=THo, Wo=Wo, fuse_relu=fuse_relu)
        out = pl.pallas_call(
            kernel,
            out_shape=jax.ShapeDtypeStruct((Ho_pad, Wo, NC_pad), xcl.dtype),
            grid=(NC_pad // TNC, grid_q),
            in_specs=[pl.BlockSpec((THo * sh, W, TNC), lambda i, q: (q, 0, i))],
            out_specs=pl.BlockSpec((THo, Wo, TNC), lambda i, q: (q, 0, i)),
            compiler_params=pltpu.CompilerParams(
                dimension_semantics=("parallel", "parallel"),
                vmem_limit_bytes=vmem_limit,
            ),
        )(x_in)
        if Ho_pad != Ho:
            out = out[:Ho]
        if NC_pad != NC:
            out = out[:, :, :NC]
        return out

    # ---- full-plane path (padded and/or overlapping windows) ----
    per_lane = itemsize * (2 * H * W + 3 * Ho * Wo)
    per_lane += itemsize * ((Hp * Wp + Hp * Wo) if padded else (H * Wo))
    if NC <= _LANE:
        TNC, NC_pad = NC, NC
    else:
        groups = _ceil_div(NC, _LANE)
        t = max(1, min(groups, budget // max(per_lane * _LANE, 1)))
        TNC = t * _LANE
        NC_pad = _ceil_div(groups, t) * TNC

    if per_lane * TNC > (vmem_limit * 3) // 4:
        # Plane too large for a single VMEM-resident block on this generation.
        # TODO(synk): halo-based H-tiling via manual DMA would keep this in
        # Pallas; fall back to XLA's reduce_window for now (still correct).
        xin = jnp.maximum(xcl, 0) if fuse_relu else xcl
        return lax.reduce_window(
            xin, -jnp.inf, lax.max,
            window_dimensions=(kh, kw, 1),
            window_strides=(sh, sw, 1),
            padding=[(ph, ph), (pw, pw), (0, 0)],
            window_dilation=(dh, dw, 1),
        )

    x_in = xcl
    if NC_pad != NC:
        x_in = jnp.pad(x_in, ((0, 0), (0, 0), (0, NC_pad - NC)))
    kernel = partial(_maxpool_kernel, kh=kh, kw=kw, sh=sh, sw=sw, dh=dh, dw=dw,
                     ph=ph, pw=pw, Ho=Ho, Wo=Wo, fuse_relu=fuse_relu)
    scratch = [pltpu.VMEM((Hp, Wp, TNC), xcl.dtype)] if padded else []
    out = pl.pallas_call(
        kernel,
        out_shape=jax.ShapeDtypeStruct((Ho, Wo, NC_pad), xcl.dtype),
        grid=(NC_pad // TNC,),
        in_specs=[pl.BlockSpec((H, W, TNC), lambda i: (0, 0, i))],
        out_specs=pl.BlockSpec((Ho, Wo, TNC), lambda i: (0, 0, i)),
        scratch_shapes=scratch,
        compiler_params=pltpu.CompilerParams(
            dimension_semantics=("parallel",),
            vmem_limit_bytes=vmem_limit,
        ),
    )(x_in)
    if NC_pad != NC:
        out = out[:, :, :NC]
    return out


def _nchw_to_cl(x):
    N, C, H, W = x.shape
    return jnp.transpose(x.reshape(N * C, H, W), (1, 2, 0)), (N, C)


def _cl_to_nchw(xcl, nc):
    N, C = nc
    Ho, Wo, _ = xcl.shape
    return jnp.transpose(xcl, (2, 0, 1)).reshape(N, C, Ho, Wo)


def max_pool2d_pallas(x, *, kernel_size, stride, padding, dilation):
    """NCHW convenience wrapper (standalone MaxPool2d.forward)."""
    xcl, nc = _nchw_to_cl(x)
    out = max_pool2d_cl(xcl, kernel_size=kernel_size, stride=stride,
                        padding=padding, dilation=dilation, fuse_relu=False)
    return _cl_to_nchw(out, nc)


# -----------------------------------------------------------------------------
# ReLU kernel (standalone; fused into the pool whenever it precedes one)
# -----------------------------------------------------------------------------


def _relu_kernel(x_ref, o_ref):
    o_ref[...] = jnp.maximum(x_ref[...], 0).astype(o_ref.dtype)


@jax.jit
def relu_pallas(x):
    shape, dtype = x.shape, x.dtype
    M = x.size
    itemsize = jnp.dtype(dtype).itemsize
    rows = pl.cdiv(M, _LANE)
    cap = max(8, (4 * 1024 * 1024) // (_LANE * itemsize))   # ~4 MiB blocks
    TR = rows if rows <= cap else cap
    rows_pad = pl.cdiv(rows, TR) * TR
    total = rows_pad * _LANE

    flat = x.reshape(-1)
    if total != M:
        flat = jnp.pad(flat, (0, total - M))
    arr = flat.reshape(rows_pad, _LANE)

    out = pl.pallas_call(
        _relu_kernel,
        out_shape=jax.ShapeDtypeStruct((rows_pad, _LANE), dtype),
        grid=(rows_pad // TR,),
        in_specs=[pl.BlockSpec((TR, _LANE), lambda i: (i, 0))],
        out_specs=pl.BlockSpec((TR, _LANE), lambda i: (i, 0)),
        compiler_params=pltpu.CompilerParams(dimension_semantics=("parallel",)),
    )(arr)
    out = out.reshape(-1)
    if total != M:
        out = out[:M]
    return out.reshape(shape)


# -----------------------------------------------------------------------------
# Minimal Module / Sequential container (forward-pass semantics of the spec)
# -----------------------------------------------------------------------------


class Module:
    def __init__(self, name: str) -> None:
        self._name = name
        self._modules = []
        self._training = False

    def register_module(self, module) -> None:
        self._modules.append(module)

    def modules(self):
        return self._modules

    def forward(self, *input):
        raise NotImplementedError

    def __call__(self, *input):
        return self.forward(*input)


class ReLU(Module):
    def __init__(self) -> None:
        super().__init__("ReLU")

    def forward(self, x):
        return relu_pallas(x)


class MaxPool2d(Module):
    """Pallas-backed equivalent of torch.nn.MaxPool2d forward (floor mode)."""

    def __init__(
        self,
        kernel_size: Union[int, Tuple],
        stride: Optional[Union[int, Tuple]] = None,
        padding: Union[int, Tuple] = 0,
        dilation: Union[int, Tuple] = 1,
    ) -> None:
        super().__init__("MaxPool2d")
        self.kernel_size = _pair(kernel_size)
        if stride is None:
            stride = kernel_size
        self.stride = _pair(stride)
        self.padding = _pair(padding)
        self.dilation = _pair(dilation)
        # TODO(synk): ceil_mode, return_indices and backward (unfold/argmax/
        # scatter/fold) are not implemented -- forward only.

    def forward(self, x):
        return max_pool2d_pallas(
            x,
            kernel_size=self.kernel_size,
            stride=self.stride,
            padding=self.padding,
            dilation=self.dilation,
        )


def _fused_pool_chain(x, run):
    """Apply a run of ReLU/MaxPool2d modules on an NCHW tensor with a single
    channels-last round trip; ReLUs preceding a pool are fused into it."""
    xcl, nc = _nchw_to_cl(x)
    pending_relu = False
    for m in run:
        if isinstance(m, ReLU):
            pending_relu = True      # relu is idempotent; fold into next pool
        else:
            xcl = max_pool2d_cl(
                xcl, kernel_size=m.kernel_size, stride=m.stride,
                padding=m.padding, dilation=m.dilation, fuse_relu=pending_relu)
            pending_relu = False
    if pending_relu:                 # trailing ReLU with no pool after it
        xcl = relu_pallas(xcl)
    return _cl_to_nchw(xcl, nc)


class Sequential(Module):
    """Chains the forwards of its registered modules (inference forward).

    Maximal runs of {ReLU, MaxPool2d} on 4-D NCHW tensors are executed with a
    single channels-last layout round trip and ReLU fused into the pool kernel
    (max and ReLU commute), which preserves the unfused semantics exactly."""

    def __init__(self, *modules) -> None:
        super().__init__("Sequential")
        for module in modules:
            self.register_module(module)
        # TODO(synk): training-mode autograd bookkeeping (autograd_tensor) and
        # backward() chaining are not implemented -- forward only.

    def forward(self, *input):
        x = input[0]
        mods = self.modules()
        i = 0
        while i < len(mods):
            m = mods[i]
            if isinstance(m, (ReLU, MaxPool2d)) and getattr(x, "ndim", 0) == 4:
                j = i
                while j < len(mods) and isinstance(mods[j], (ReLU, MaxPool2d)):
                    j += 1
                run = mods[i:j]
                if any(isinstance(r, MaxPool2d) for r in run):
                    x = _fused_pool_chain(x, run)
                else:
                    x = relu_pallas(x)
                i = j
            else:
                x = m.forward(x)
                i += 1
        return x


# -----------------------------------------------------------------------------
# Pure-JAX references
# -----------------------------------------------------------------------------


def _maxpool_reference(x, kernel_size, stride, padding, dilation):
    kh, kw = kernel_size
    sh, sw = stride
    ph, pw = padding
    dh, dw = dilation
    return lax.reduce_window(
        x,
        -jnp.inf,
        lax.max,
        window_dimensions=(1, 1, kh, kw),
        window_strides=(1, 1, sh, sw),
        padding=[(0, 0), (0, 0), (ph, ph), (pw, pw)],
        window_dilation=(1, 1, dh, dw),
    )


if __name__ == "__main__":
    key = jax.random.PRNGKey(0)
    x = jax.random.normal(key, (2, 4, 16, 16), dtype=jnp.float32)

    # Standalone ReLU.
    y = jax.block_until_ready(ReLU()(x))
    assert bool(jnp.allclose(y, jnp.maximum(x, 0.0)))

    # Standalone MaxPool2d configs (exercise clean/padded/dilated/asymmetric).
    pool_configs = [
        dict(kernel_size=2),                                     # clean H-tiled path
        dict(kernel_size=3, stride=2, padding=1, dilation=1),    # overlapping, padded
        dict(kernel_size=2, stride=2, padding=1, dilation=2),    # dilated
        dict(kernel_size=3, stride=1, padding=1),                 # unit stride
        dict(kernel_size=(3, 2), stride=(1, 2), padding=(1, 0)),  # asymmetric
    ]
    for cfg in pool_configs:
        m = MaxPool2d(**cfg)
        y = jax.block_until_ready(m(x))
        ref = _maxpool_reference(x, m.kernel_size, m.stride, m.padding, m.dilation)
        assert y.shape == ref.shape, (cfg, y.shape, ref.shape)
        assert y.dtype == ref.dtype, (cfg, y.dtype, ref.dtype)
        assert bool(jnp.allclose(y, ref)), cfg

    # Sequential forward: fused ReLU->pool chain, persistent channels-last.
    model = Sequential(ReLU(), MaxPool2d(2), MaxPool2d(kernel_size=3, stride=2, padding=1))
    y = jax.block_until_ready(model(x))
    ref = jnp.maximum(x, 0.0)
    ref = _maxpool_reference(ref, (2, 2), (2, 2), (0, 0), (1, 1))
    ref = _maxpool_reference(ref, (3, 3), (2, 2), (1, 1), (1, 1))
    assert y.shape == ref.shape, (y.shape, ref.shape)
    assert bool(jnp.allclose(y, ref))

    print("KERNEL_OK")
</pallas_src>

<mosaic_0001>
module attributes {stable_mosaic.version = 11 : i64} {
  func.func @_relu_kernel(%arg0: i32, %arg1: memref<16x128xf32, #tpu.memory_space<vmem>>, %arg2: memref<16x128xf32, #tpu.memory_space<vmem>>) attributes {dimension_semantics = [#tpu.dimension_semantics<parallel>], iteration_bounds = array<i64: 1>, scalar_prefetch = 0 : i64, scratch_operands = 0 : i64, tpu.core_type = #tpu.core_type<tc>, window_params = [{transform_indices = @transform_0, window_bounds = array<i64: 16, 128>}, {transform_indices = @transform_1, window_bounds = array<i64: 16, 128>}]} {
    %c0 = arith.constant 0 : index
    %c0_0 = arith.constant 0 : index
    %0 = vector.load %arg1[%c0, %c0_0] : memref<16x128xf32, #tpu.memory_space<vmem>>, vector<16x128xf32>
    %cst = arith.constant 0.000000e+00 : f32
    %1 = vector.broadcast %cst : f32 to vector<16x128xf32>
    %2 = arith.maximumf %0, %1 : vector<16x128xf32>
    %c0_1 = arith.constant 0 : index
    %c0_2 = arith.constant 0 : index
    %3 = vector.load %arg2[%c0_1, %c0_2] : memref<16x128xf32, #tpu.memory_space<vmem>>, vector<16x128xf32>
    tpu.vector_store %arg2[%c0_1, %c0_2], %2 {strides = array<i32>} : memref<16x128xf32, #tpu.memory_space<vmem>>, vector<16x128xf32>,
    return
  }
  func.func @transform_0(%arg0: i32) -> (i32, i32) {
    %c0_i32 = arith.constant 0 : i32
    %c0_i32_0 = arith.constant 0 : i32
    return %arg0, %c0_i32 : i32, i32
  }
  func.func @transform_1(%arg0: i32) -> (i32, i32) {
    %c0_i32 = arith.constant 0 : i32
    %c0_i32_0 = arith.constant 0 : i32
    return %arg0, %c0_i32 : i32, i32
  }
}

</mosaic_0001>

<bundles_post_ra>
// kernel: relu_pallas.1
= control target key start
LH: loop header
LB: loop body
LE: loop exit
PB: predicated region body
PF: predicated region fallthrough
CT: control target
= control target key end

     0   :  { %s40_s0 = inlined_call_operand.vmem [shape: f32[16,128], index: 0, kind: input, shape index: {}]   ;;  %s41_s1 = inlined_call_operand.vmem [shape: f32[16,128], index: 1, kind: output, shape index: {}]  }
   0x1   :  { %v8_v0 = vld [vmem:[%s40_s0] sm:$0xff]  ;;  %v9_v1 = vld [vmem:[%s40_s0 + $0x8] sm:$0xff] }
   0x2   :  { %v10_v2 = vmax.f32 %v8_v0, 0.0  ;;  %v11_v3 = vmax.f32 %v9_v1, 0.0 }
   0x4   :  { %12 = vst [vmem:[%s41_s1] sm:$0xff] %v10_v2 }
   0x5   :  { %13 = vst [vmem:[%s41_s1 + $0x8] sm:$0xff] %v11_v3 }

</bundles_post_ra>
